<compile_context>
chip_gen: v6e
topology: v6e:2x2x1
jax: 0.10.0
libtpu: 0.0.40
codegen_flags: <defaults>
</compile_context>

<pallas_src>
import jax
import jax.numpy as jnp
from jax.experimental import pallas as pl
from jax.experimental.pallas import tpu as pltpu

BN_EPS = 1e-5


def _round_up(x, m):
    return ((x + m - 1) // m) * m


def _make_kernel(tk, x_resident):
    def kernel(x_ref, w_ref, gamma_ref, beta_ref, o_ref):
        # x_ref: (N, K_pad) if x_resident else (N, TK)
        # w_ref: (TK, TN) in pre-transposed (in, out) layout
        # gamma_ref / beta_ref: (1, TN);  o_ref: (N, TN) f32 (also the K-axis accumulator)
        k = pl.program_id(1)

        @pl.when(k == 0)
        def _init():
            o_ref[...] = jnp.zeros_like(o_ref)

        if x_resident:
            start = pl.multiple_of(k * tk, tk)
            x_blk = x_ref[:, pl.ds(start, tk)]
        else:
            x_blk = x_ref[...]

        o_ref[...] += jnp.dot(x_blk, w_ref[...], preferred_element_type=jnp.float32)

        @pl.when(k == pl.num_programs(1) - 1)
        def _finalize():
            y = o_ref[...]
            inv_n = 1.0 / y.shape[0]
            # Training-mode BatchNorm1d: biased batch statistics over the batch axis.
            mean = jnp.sum(y, axis=0, keepdims=True) * inv_n
            centered = y - mean                                # two-pass variance (stable)
            var = jnp.sum(centered * centered, axis=0, keepdims=True) * inv_n
            y_hat = centered * jax.lax.rsqrt(var + BN_EPS)     # rsqrt -> EUP slot
            out = y_hat * gamma_ref[...] + beta_ref[...]
            o_ref[...] = jnp.maximum(out, 0.0)

    return kernel


def prepare_params(weight, gamma, beta, *, matmul_dtype=jnp.bfloat16):
    """One-time weight/affine preparation (do this at init, NOT per forward call).

    weight: (out_dim, in_dim) PyTorch nn.Linear layout.
    Returns a dict of device arrays plus static tiling metadata for mlp_block_apply.
    """
    out_dim, in_dim = weight.shape
    k_base = _round_up(in_dim, 128)
    out_base = _round_up(out_dim, 128)

    # Lane-dense tiles; bigger TK when K is large (fewer grid steps, larger W DMAs).
    if k_base >= 2048 and k_base % 1024 == 0:
        tk = 1024
    else:
        tk = next(t for t in (512, 256, 128) if k_base % t == 0)
    tn = next(t for t in (256, 128) if out_base % t == 0)
    k_pad, out_pad = k_base, out_base

    # Pre-transpose to (in, out), cast and zero-pad ONCE (outside the per-call hot path).
    w_t = weight.T.astype(matmul_dtype)
    w_t = jnp.pad(w_t, ((0, k_pad - in_dim), (0, out_pad - out_dim)))
    g2 = jnp.pad(gamma.astype(jnp.float32).reshape(1, out_dim), ((0, 0), (0, out_pad - out_dim)))
    b2 = jnp.pad(beta.astype(jnp.float32).reshape(1, out_dim), ((0, 0), (0, out_pad - out_dim)))

    return dict(w=w_t, gamma=g2, beta=b2, in_dim=in_dim, out_dim=out_dim,
                k_pad=k_pad, out_pad=out_pad, tk=tk, tn=tn,
                matmul_dtype=jnp.dtype(matmul_dtype))


def mlp_block_apply(x, params, *, force_x_resident=None):
    """Forward of MLP_block given pre-prepared params (see prepare_params)."""
    n, in_dim = x.shape
    assert in_dim == params["in_dim"], "in_dim mismatch with prepared params"
    tk, tn = params["tk"], params["tn"]
    k_pad, out_pad = params["k_pad"], params["out_pad"]
    out_dim = params["out_dim"]
    dt = params["matmul_dtype"]
    itm = dt.itemsize
    nj, nk = out_pad // tn, k_pad // tk

    x_in = x.astype(dt)
    if k_pad != in_dim:
        x_in = jnp.pad(x_in, ((0, 0), (0, k_pad - in_dim)))

    # ---- generation-aware scoped-VMEM budget ----
    try:
        vmem_cap = int(pltpu.get_tpu_info().vmem_capacity_bytes)   # 128 MiB v5e/v6e, 64 MiB v7x
    except Exception:
        vmem_cap = 64 << 20                                        # conservative fallback
    scoped_cap = (vmem_cap * 3) // 4

    w_bytes = 2 * tn * tk * itm            # W tiles, double-buffered
    out_bytes = 2 * n * tn * 4             # f32 output / accumulator tiles
    gb_bytes = 4 * tn * 4                  # gamma / beta tiles
    x_res_bytes = n * k_pad * itm          # x resident: one full-K block, DMA'd once
    x_stream_bytes = 2 * n * tk * itm      # x streamed over K, double-buffered

    resident_est = x_res_bytes + w_bytes + out_bytes + gb_bytes
    stream_est = x_stream_bytes + w_bytes + out_bytes + gb_bytes

    if force_x_resident is None:
        # Only worth it when x would otherwise be re-fetched (nj > 1) and it fits comfortably.
        x_resident = (nj > 1) and int(resident_est * 1.3) < scoped_cap
    else:
        x_resident = bool(force_x_resident)

    vmem_est = resident_est if x_resident else stream_est
    if vmem_est > scoped_cap:
        # TODO(synk): tile the batch axis (M grid axis + two-pass BN: per-tile sum/sumsq partials,
        # then a cheap normalize+ReLU pass) to support very large N, esp. on v7x's 64 MiB VMEM.
        raise ValueError(
            f"MLP_block batch block needs ~{vmem_est >> 20} MiB VMEM, exceeding the "
            f"~{scoped_cap >> 20} MiB scoped budget; reduce the batch size.")
    vmem_limit = min(int(vmem_est * 1.5) + (2 << 20), scoped_cap)

    if x_resident:
        x_spec = pl.BlockSpec((n, k_pad), lambda j, k: (0, 0))    # DMA'd once, sliced in-kernel
    else:
        x_spec = pl.BlockSpec((n, tk), lambda j, k: (0, k))       # streamed over K per out-tile

    cost = pl.CostEstimate(
        flops=2 * n * k_pad * out_pad,
        transcendentals=out_pad,
        bytes_accessed=n * k_pad * itm + k_pad * out_pad * itm + n * out_pad * 4,
    )

    out = pl.pallas_call(
        _make_kernel(tk, x_resident),
        out_shape=jax.ShapeDtypeStruct((n, out_pad), jnp.float32),
        grid=(nj, nk),
        in_specs=[
            x_spec,
            pl.BlockSpec((tk, tn), lambda j, k: (k, j)),   # W in (in, out) layout -> plain x @ W
            pl.BlockSpec((1, tn), lambda j, k: (0, j)),    # gamma
            pl.BlockSpec((1, tn), lambda j, k: (0, j)),    # beta
        ],
        out_specs=pl.BlockSpec((n, tn), lambda j, k: (0, j)),
        compiler_params=pltpu.CompilerParams(
            dimension_semantics=("parallel", "arbitrary"),
            vmem_limit_bytes=vmem_limit,
        ),
        cost_estimate=cost,
    )(x_in, params["w"], params["gamma"], params["beta"])

    return out[:, :out_dim] if out_pad != out_dim else out


def mlp_block(x, weight, bias, gamma, beta, *, matmul_dtype=jnp.bfloat16, force_x_resident=None):
    """Convenience one-shot forward (prepares weights per call).

    For repeated calls, call prepare_params once and reuse it with mlp_block_apply so the per-call
    wrapper does no extra HBM pass over W.  `bias` is accepted for API parity but is exactly
    cancelled by the training-mode BatchNorm mean subtraction (note: must be re-added if this
    block is ever run with eval-mode BN running stats).
    """
    del bias
    params = prepare_params(weight, gamma, beta, matmul_dtype=matmul_dtype)
    return mlp_block_apply(x, params, force_x_resident=force_x_resident)


def mlp_block_ref(x, weight, bias, gamma, beta):
    y = jnp.dot(x, weight.T, precision=jax.lax.Precision.HIGHEST) + bias
    mean = jnp.mean(y, axis=0, keepdims=True)
    var = jnp.mean((y - mean) ** 2, axis=0, keepdims=True)
    y_hat = (y - mean) / jnp.sqrt(var + BN_EPS)
    return jnp.maximum(y_hat * gamma + beta, 0.0)


if __name__ == "__main__":
    key = jax.random.PRNGKey(0)

    def make_inputs(k, n, in_dim, out_dim):
        k_x, k_w, k_b, k_g, k_be = jax.random.split(k, 5)
        x = jax.random.normal(k_x, (n, in_dim), dtype=jnp.float32)
        weight = jax.random.normal(k_w, (out_dim, in_dim), dtype=jnp.float32) / jnp.sqrt(in_dim)
        bias = 0.1 * jax.random.normal(k_b, (out_dim,), dtype=jnp.float32)
        gamma = 1.0 + 0.1 * jax.random.normal(k_g, (out_dim,), dtype=jnp.float32)
        beta = 0.1 * jax.random.normal(k_be, (out_dim,), dtype=jnp.float32)
        return x, weight, bias, gamma, beta

    k1, k2 = jax.random.split(key)

    # 1) Lane-dense shape: 2 out-tiles x 2 K-tiles, bf16 MXU path, x resident across out-tiles.
    x, w, b, g, be = make_inputs(k1, 32, 1024, 512)
    params = prepare_params(w, g, be)              # one-time weight layout / cast / pad
    out = jax.block_until_ready(mlp_block_apply(x, params))
    ref = mlp_block_ref(x, w, b, g, be)
    assert out.shape == ref.shape
    assert bool(jnp.all(jnp.isfinite(out)))
    assert jnp.allclose(out, ref, atol=5e-2, rtol=5e-2), "bf16 resident-x path mismatch"

    # 1b) Same shape, streamed-x path (x re-fetched per out-tile) to cover both kernel variants.
    out = jax.block_until_ready(mlp_block_apply(x, params, force_x_resident=False))
    assert jnp.allclose(out, ref, atol=5e-2, rtol=5e-2), "bf16 streamed-x path mismatch"

    # 2) Ragged shape exercising the zero-padding path, f32 matmul parity path.
    x, w, b, g, be = make_inputs(k2, 16, 100, 96)
    out = jax.block_until_ready(mlp_block(x, w, b, g, be, matmul_dtype=jnp.float32))
    ref = mlp_block_ref(x, w, b, g, be)
    assert out.shape == ref.shape
    assert bool(jnp.all(jnp.isfinite(out)))
    assert jnp.allclose(out, ref, atol=2e-2, rtol=2e-2), "f32 ragged path mismatch"

    print("KERNEL_OK")
</pallas_src>

<mosaic_0001>
module attributes {stable_mosaic.version = 11 : i64} {
  func.func @kernel(%arg0: i32, %arg1: i32, %arg2: memref<32x1024xbf16, #tpu.memory_space<vmem>>, %arg3: memref<512x256xbf16, #tpu.memory_space<vmem>>, %arg4: memref<1x256xf32, #tpu.memory_space<vmem>>, %arg5: memref<1x256xf32, #tpu.memory_space<vmem>>, %arg6: memref<32x256xf32, #tpu.memory_space<vmem>>) attributes {dimension_semantics = [#tpu.dimension_semantics<parallel>, #tpu.dimension_semantics<arbitrary>], iteration_bounds = array<i64: 2, 2>, scalar_prefetch = 0 : i64, scratch_operands = 0 : i64, tpu.core_type = #tpu.core_type<tc>, window_params = [{pipeline_mode = #tpu.pipeline_mode<synchronous>, transform_indices = @transform_0, window_bounds = array<i64: 32, 1024>}, {transform_indices = @transform_1, window_bounds = array<i64: 512, 256>}, {transform_indices = @transform_2, window_bounds = array<i64: 1, 256>}, {transform_indices = @transform_3, window_bounds = array<i64: 1, 256>}, {transform_indices = @transform_4, window_bounds = array<i64: 32, 256>}]} {
    %c0_i32 = arith.constant 0 : i32
    %0 = arith.cmpi eq, %arg1, %c0_i32 : i32
    %1 = arith.extui %0 : i1 to i32
    %c0_i32_0 = arith.constant 0 : i32
    %2 = arith.cmpi ne, %1, %c0_i32_0 : i32
    scf.if %2 {
      %cst_8 = arith.constant 0.000000e+00 : f32
      %15 = vector.broadcast %cst_8 : f32 to vector<32x256xf32>
      %c0_9 = arith.constant 0 : index
      %c0_10 = arith.constant 0 : index
      %16 = vector.load %arg6[%c0_9, %c0_10] : memref<32x256xf32, #tpu.memory_space<vmem>>, vector<32x256xf32>
      tpu.vector_store %arg6[%c0_9, %c0_10], %15 {strides = array<i32>} : memref<32x256xf32, #tpu.memory_space<vmem>>, vector<32x256xf32>,
    } else {
    }
    %c512_i32 = arith.constant 512 : i32
    %3 = arith.muli %arg1, %c512_i32 : i32
    %4 = tpu.assume_multiple %3, 512 : i32
    %c0 = arith.constant 0 : index
    %5 = arith.index_cast %4 : i32 to index
    %6 = vector.load %arg2[%c0, %5] : memref<32x1024xbf16, #tpu.memory_space<vmem>>, vector<32x512xbf16>
    %c0_1 = arith.constant 0 : index
    %c0_2 = arith.constant 0 : index
    %7 = vector.load %arg6[%c0_1, %c0_2] : memref<32x256xf32, #tpu.memory_space<vmem>>, vector<32x256xf32>
    %c0_3 = arith.constant 0 : index
    %c0_4 = arith.constant 0 : index
    %8 = vector.load %arg3[%c0_3, %c0_4] : memref<512x256xbf16, #tpu.memory_space<vmem>>, vector<512x256xbf16>
    %cst = arith.constant dense<0.000000e+00> : vector<32x256xf32>
    %9 = tpu.matmul %6, %8, %cst {dimension_numbers = #tpu.dot_dimension_numbers<[1], [0], [0], [1], [0, 0, 1, 1], [], []>} : vector<32x512xbf16>, vector<512x256xbf16>, vector<32x256xf32> -> vector<32x256xf32>
    %10 = arith.addf %7, %9 : vector<32x256xf32>
    %c0_5 = arith.constant 0 : index
    %c0_6 = arith.constant 0 : index
    %11 = vector.load %arg6[%c0_5, %c0_6] : memref<32x256xf32, #tpu.memory_space<vmem>>, vector<32x256xf32>
    tpu.vector_store %arg6[%c0_5, %c0_6], %10 {strides = array<i32>} : memref<32x256xf32, #tpu.memory_space<vmem>>, vector<32x256xf32>,
    %c1_i32 = arith.constant 1 : i32
    %12 = arith.cmpi eq, %arg1, %c1_i32 : i32
    %13 = arith.extui %12 : i1 to i32
    %c0_i32_7 = arith.constant 0 : i32
    %14 = arith.cmpi ne, %13, %c0_i32_7 : i32
    scf.if %14 {
      %c0_8 = arith.constant 0 : index
      %c0_9 = arith.constant 0 : index
      %15 = vector.load %arg6[%c0_8, %c0_9] : memref<32x256xf32, #tpu.memory_space<vmem>>, vector<32x256xf32>
      %cst_10 = arith.constant dense<0.000000e+00> : vector<256xf32>
      %16 = vector.multi_reduction <add>, %15, %cst_10 [0] : vector<32x256xf32> to vector<256xf32>
      %17 = vector.shape_cast %16 : vector<256xf32> to vector<1x256xf32>
      %cst_11 = arith.constant 3.125000e-02 : f32
      %18 = vector.broadcast %cst_11 : f32 to vector<1x256xf32>
      %19 = arith.mulf %17, %18 : vector<1x256xf32>
      %20 = vector.broadcast %19 : vector<1x256xf32> to vector<32x256xf32>
      %21 = arith.subf %15, %20 : vector<32x256xf32>
      %22 = arith.mulf %21, %21 : vector<32x256xf32>
      %cst_12 = arith.constant dense<0.000000e+00> : vector<256xf32>
      %23 = vector.multi_reduction <add>, %22, %cst_12 [0] : vector<32x256xf32> to vector<256xf32>
      %24 = vector.shape_cast %23 : vector<256xf32> to vector<1x256xf32>
      %cst_13 = arith.constant 3.125000e-02 : f32
      %25 = vector.broadcast %cst_13 : f32 to vector<1x256xf32>
      %26 = arith.mulf %24, %25 : vector<1x256xf32>
      %cst_14 = arith.constant 9.99999974E-6 : f32
      %27 = vector.broadcast %cst_14 : f32 to vector<1x256xf32>
      %28 = arith.addf %26, %27 : vector<1x256xf32>
      %29 = math.rsqrt %28 : vector<1x256xf32>
      %30 = vector.broadcast %29 : vector<1x256xf32> to vector<32x256xf32>
      %31 = arith.mulf %21, %30 : vector<32x256xf32>
      %c0_15 = arith.constant 0 : index
      %c0_16 = arith.constant 0 : index
      %32 = vector.load %arg4[%c0_15, %c0_16] : memref<1x256xf32, #tpu.memory_space<vmem>>, vector<1x256xf32>
      %33 = vector.broadcast %32 : vector<1x256xf32> to vector<32x256xf32>
      %34 = arith.mulf %31, %33 : vector<32x256xf32>
      %c0_17 = arith.constant 0 : index
      %c0_18 = arith.constant 0 : index
      %35 = vector.load %arg5[%c0_17, %c0_18] : memref<1x256xf32, #tpu.memory_space<vmem>>, vector<1x256xf32>
      %36 = vector.broadcast %35 : vector<1x256xf32> to vector<32x256xf32>
      %37 = arith.addf %34, %36 : vector<32x256xf32>
      %cst_19 = arith.constant 0.000000e+00 : f32
      %38 = vector.broadcast %cst_19 : f32 to vector<32x256xf32>
      %39 = arith.maximumf %37, %38 : vector<32x256xf32>
      %c0_20 = arith.constant 0 : index
      %c0_21 = arith.constant 0 : index
      %40 = vector.load %arg6[%c0_20, %c0_21] : memref<32x256xf32, #tpu.memory_space<vmem>>, vector<32x256xf32>
      tpu.vector_store %arg6[%c0_20, %c0_21], %39 {strides = array<i32>} : memref<32x256xf32, #tpu.memory_space<vmem>>, vector<32x256xf32>,
    } else {
    }
    return
  }
  func.func @transform_0(%arg0: i32, %arg1: i32) -> (i32, i32) {
    %c0_i32 = arith.constant 0 : i32
    %c0_i32_0 = arith.constant 0 : i32
    %c0_i32_1 = arith.constant 0 : i32
    return %c0_i32, %c0_i32_0 : i32, i32
  }
  func.func @transform_1(%arg0: i32, %arg1: i32) -> (i32, i32) {
    %c0_i32 = arith.constant 0 : i32
    return %arg1, %arg0 : i32, i32
  }
  func.func @transform_2(%arg0: i32, %arg1: i32) -> (i32, i32) {
    %c0_i32 = arith.constant 0 : i32
    %c0_i32_0 = arith.constant 0 : i32
    return %c0_i32, %arg0 : i32, i32
  }
  func.func @transform_3(%arg0: i32, %arg1: i32) -> (i32, i32) {
    %c0_i32 = arith.constant 0 : i32
    %c0_i32_0 = arith.constant 0 : i32
    return %c0_i32, %arg0 : i32, i32
  }
  func.func @transform_4(%arg0: i32, %arg1: i32) -> (i32, i32) {
    %c0_i32 = arith.constant 0 : i32
    %c0_i32_0 = arith.constant 0 : i32
    return %c0_i32, %arg0 : i32, i32
  }
}

</mosaic_0001>

<bundles_post_ra>
// kernel: tpu_custom_call.1
= control target key start
LH: loop header
LB: loop body
LE: loop exit
PB: predicated region body
PF: predicated region fallthrough
CT: control target
= control target key end

     0   :  { %s2152_s0 = inlined_call_operand.hbm [shape: bf16[32,1024], index: 0, kind: input, shape index: {}]   ;;  %s2153_s1 = inlined_call_operand.hbm [shape: bf16[1024,512], index: 1, kind: input, shape index: {}]   ;;  %s2154_s2 = inlined_call_operand.hbm [shape: f32[1,512], index: 2, kind: input, shape index: {}]   ;;  %s2155_s3 = inlined_call_operand.vmem [shape: f32[1,512], index: 3, kind: input, shape index: {}]   ;;  %s2156_s4 = inlined_call_operand.hbm [shape: f32[32,512], index: 4, kind: output, shape index: {}]  }
   0x1   :  { %2165 = sst [smem:[#allocation16_spill]] %s2152_s0 }
   0x2   :  { %2166 = sst [smem:[#allocation17_spill]] %s2153_s1 }
   0x3   :  { %2167 = sst [smem:[#allocation18_spill]] %s2155_s3 }
   0x4   :  { %2168 = sst [smem:[#allocation19_spill]] %s2156_s4 }
   0x5   :  { %9 = vsyncpa [#allocation3], 0 }
   0x6   :  { %10 = vsyncpa [#allocation6], 0 }
   0x7   :  { %12 = vsyncpa [#allocation6 + $0x1], 0 }
   0x8   :  { %13 = vsyncpa [#allocation4], 0 }
   0x9   :  { %15 = vsyncpa [#allocation4 + $0x1], 0  ;;  %s1745_s15 = smov 0   ;;  %s1747_s16 = smov 0  }
   0xa   :  { %s1749_s17 = smov 0   ;;  %s1751_s18 = smov 0  }
   0xb   :  { %s1753_s19 = smov 0   ;;  %s1755_s20 = smov 0  }
   0xc   :  { %s1757_s21 = smov 0   ;;  %s1759_s22 = smov 0  }
   0xd   :  { %s1761_s23 = smov 0   ;;  %s1763_s24 = smov 0  }
   0xe   :  { %s1765_s25 = smov 0  }
   0xf LB: > { %2169 = sst [smem:[#allocation13_spill]] %s1689_s21  ;;  %s30_s26 = sadd.s32 1, %s1697_s23  ;;  %s1705_s25 = sphi %s1765_s25, %s21_s25   ;;  %s1701_s24 = sphi %s1763_s24, %s2206_s24   ;;  %s1697_s23 = sphi %s1761_s23, %s2205_s23   ;;  %s1693_s22 = sphi %s1759_s22, %s2204_s22   ;;  %s1689_s21 = sphi %s1757_s21, %s2203_s21   ;;  %s1685_s20 = sphi %s1755_s20, %s2202_s20   ;;  %s1681_s19 = sphi %s1753_s19, %s2201_s19   ;;  %s1677_s18 = sphi %s1751_s18, %s2200_s18   ;;  %s1673_s17 = sphi %s1749_s17, %s2199_s17   ;;  %s1669_s16 = sphi %s1747_s16, %s2198_s16   ;;  %s1665_s15 = sphi %s1745_s15, %s2197_s15  }
  0x10   : > { %s33_s27 = sadd.s32 1, %s1701_s24  ;;  %p31_p0 = scmp.ge.s32.totalorder %s30_s26, 2 }
  0x11   : > { %s63_s28 = sadd.s32 1, %s1685_s20  ;;  %p70_p1 = scmp.ne.s32.totalorder %s1685_s20, %s1681_s19 }
  0x12   : > { %p2162_p2 = scmp.eq.s32.totalorder %s1705_s25, 0  ;;  %s2208_s26 = smov (%p31_p0, %s30_s26), 0 }
  0x13   : > { %2170 = sst [smem:[#allocation14_spill]] %s2208_s26  ;;  %s2210_s27 = smov (!%p31_p0, %s33_s27), %s1701_s24 }
  0x14   : > { %s58_s29 = ssub.s32 %s1697_s23, %s2208_s26  ;;  %p1813_p3 = por %p2162_p2, %p70_p1 }
  0x15   : > { %p35_p4 = scmp.ge.s32.totalorder %s2210_s27, 2  ;;  %p2161_p5 = scmp.lt.s32.totalorder %s1705_s25, 4 }
  0x16   : > { %s191_s5 = sand.u32 1, %s1705_s25   ;;  %s193_s6 = sand.u32 1, %s1685_s20  }
  0x17   : > { %s2212_s27 = smov (%p35_p4, %s2210_s27), 0  ;;  %s1170_s8 = sshll.u32 %s193_s6, 9 }
  0x18   : > { %2172 = sst [smem:[#allocation15_spill]] %s2212_s27  ;;  %s1824_s7 = ssub.s32 %s1701_s24, %s2212_s27 }
  0x19   : > { %s60_s9 = sor.u32 %s1824_s7, %s58_s29  ;;  %s1172_s10 = sshll.u32 %s1701_s24, 1 }
  0x1a   : > { %p61_p6 = scmp.eq.s32.totalorder %s60_s9, 0  ;;  %s1265_s11 = sshll.u32 %s1697_s23, 8 }
  0x1b   : > { %s195_s12 = scalar_lea.vmem [#allocation5], %s1170_s8  ;;  %s202_s26 = sadd.s32 %s1265_s11, %s1172_s10 }
  0x1c   : > { %s205_s13 = sshll.u32 %s195_s12, 4  ;;  %s1174_s4 = sshll.u32 %s202_s26, 6  ;;  %s206_s13 = int_to_ptr.vmem [resolvable:$true] %s205_s13 }
  0x1d   : > { %s1830_s14 = scalar_select %p61_p6, %s1685_s20, %s63_s28  }
  0x1e   : > { %p1836_p7 = pnand %p2161_p5, %p1813_p3  ;;  %s2174_s1 = sld [smem:[#allocation17_spill]] }
  0x1f   : > { %s1843_s6 = scalar_lea.sflag [#allocation6], %s191_s5  ;;  %s1508_s28 = scalar_lea.vmem %s206_s13, 8192 }
  0x20   : > { %p1497_p8 = pneg %p1836_p7  ;;  %p1509_p9 = scmp.ne.s32.totalorder %s206_s13, %s1508_s28 }
  0x21   : > { %s1707_s26 = smov [#allocation5]  }
  0x22   : > { %p1511_p10 = pnand %p1509_p9, %p1497_p8  ;;  %s1513_s30 = sshll.u32 %s1707_s26, 4  ;;  %s1514_s30 = int_to_ptr.vmem [resolvable:$false] %s1513_s30 }
  0x23   : > { %s1515_s8 = scalar_lea.vmem %s1514_s30, 16384  ;;  %p1516_p12 = scmp.lt.s32.totalorder %s206_s13, %s1514_s30 }
  0x24   : > { %s204_s29 = scalar_lea.hbm %s2174_s1, %s1174_s4  ;;  %p1512_p11 = pneg %p1511_p10 }
  0x25   : > { %p1517_p13 = scmp.lt.s32.totalorder %s1515_s8, %s1508_s28 }
  0x27   : > { %p1518_p0 = por %p1517_p13, %p1516_p12 }
  0x29   : > { %p1519_p1 = pnand %p1518_p0, %p1512_p11 }
  0x2b   : > { %1522 = shalt.err (!%p1519_p1)
}
  0x2c   : > { %s1708_s3 = smov 256   ;;  %s1709_s4 = smov 128  }
  0x2d   : > { %s1710_s27 = smov 8   ;;  %s1851_s5 = sadd.s32 4294967295, %s1705_s25  }
  0x2e   : > { %1285 = dma.hbm_to_vmem [thread:$0]  (!%p1836_p7), %s204_s29, 8192, %s206_s13, %s1843_s6, %s1708_s3, %s1709_s4, %s1710_s27  }
  0x2f   : > { %p76_p3 = scmp.ne.s32.totalorder %s1681_s19, %s1677_s18  ;;  %p2163_p4 = scmp.eq.s32.totalorder %s1851_s5, 0 }
  0x30   : > { %p1167_p8 = scmp.ge.s32.totalorder %s1705_s25, 1  ;;  %p165_p10 = scmp.lt.s32.totalorder %s1705_s25, 5 }
  0x31   : > { %p1860_p9 = por %p2163_p4, %p76_p3  ;;  %s1711_s21 = smov [#allocation2]  }
  0x32   : > { %p1865_p11 = pnand %p1167_p8, %p165_p10  ;;  %s177_s11 = sshll.u32 %s1711_s21, 4  ;;  %s178_s11 = int_to_ptr.vmem [resolvable:$true] %s177_s11 }
  0x33   : > { %s1534_s18 = scalar_lea.vmem %s178_s11, 2048  ;;  %p1542_p5 = scmp.lt.s32.totalorder %s178_s11, %s178_s11 }
  0x34   : > { %p1278_p7 = pneg %p1865_p11  ;;  %p1535_p0 = scmp.ne.s32.totalorder %s178_s11, %s1534_s18 }
  0x35   : > { %p1543_p6 = scmp.lt.s32.totalorder %s1534_s18, %s1534_s18 }
  0x36   : > { %p1279_p12 = pnand %p1278_p7, %p2163_p4 }
  0x37   : > { %p1544_p2 = por %p1543_p6, %p1542_p5 }
  0x38   : > { %p1525_p13 = pneg %p1279_p12 }
  0x3a   : > { %p1537_p1 = pnand %p1535_p0, %p1525_p13 }
  0x3c   : > { %p1538_p3 = pneg %p1537_p1 }
  0x3e   : > { %p1545_p8 = pnand %p1544_p2, %p1538_p3 }
  0x40   : > { %1548 = shalt.err (!%p1545_p8)
}
  0x41   : > { %s1712_s12 = smov 512   ;;  %s1713_s13 = smov 32  }
  0x42   : > { %s2177_s0 = sld [smem:[#allocation16_spill]]  ;;  %s1166_s26 = sadd.s32 4294967294, %s1705_s25  }
  0x43   : > { %p87_p2 = scmp.eq.s32.totalorder %s1824_s7, 0  ;;  %s89_s30 = sadd.s32 1, %s1673_s17 }
  0x44   : > { %p96_p5 = scmp.ne.s32.totalorder %s1673_s17, %s1669_s16  ;;  %p2178_p6 = scmp.eq.s32.totalorder %s1705_s25, 0 }
  0x45   : > { %s1882_s8 = scalar_select %p87_p2, %s1673_s17, %s89_s30  }
  0x46   : > { %p1886_p10 = por %p96_p5, %p2178_p6  ;;  %p102_p7 = scmp.ne.s32.totalorder %s1669_s16, %s1665_s15 }
  0x47   : > { %p2180_p13 = scmp.eq.s32.totalorder %s1851_s5, 3  ;;  %s217_s27 = sand.u32 1, %s1673_s17  }
  0x48   : > { %1281 = dma.hbm_to_vmem [thread:$0]  (!%p1279_p12), %s2177_s0, 2048, %s178_s11, [#allocation3], %s1712_s12, %s1712_s12, %s1713_s13  }
  0x49   : > { %p1894_p0 = por %p2180_p13, %p96_p5  ;;  %p158_p12 = scmp.eq.s32.totalorder %s1166_s26, 3 }
  0x4a   : > { %p1900_p1 = por %p102_p7, %p2163_p4  ;;  %s1175_s11 = sshll.u32 %s217_s27, 1 }
  0x4b   : > { %s2181_s4 = scalar_select %p1894_p0, 1, 0 }
  0x4c   : > { %p1905_p3 = por %p158_p12, %p102_p7  ;;  %s1266_s18 = sshll.u32 %s1701_s24, 5 }
  0x4d   : > { %s225_s29 = scalar_lea.hbm %s2154_s2, %s1266_s18  ;;  %s219_s28 = scalar_lea.vmem [#allocation7], %s1175_s11 }
  0x4e   : > { %s2183_s21 = scalar_select %p1905_p3, 1, 0 }
  0x4f   : > { %s227_s30 = sshll.u32 %s219_s28, 4  ;;  %p2184_p8 = scmp.lt.s32.totalorder %s1705_s25, 4  ;;  %s228_s30 = int_to_ptr.vmem [resolvable:$true] %s227_s30 }
  0x50   : > { %s1562_s0 = scalar_lea.vmem %s228_s30, 32  ;;  %s1714_s27 = smov [#allocation7]  }
  0x51   : > { %p1917_p2 = pnand %p2184_p8, %p1886_p10  ;;  %p1563_p6 = scmp.ne.s32.totalorder %s228_s30, %s1562_s0 }
  0x52   : > { %s1567_s1 = sshll.u32 %s1714_s27, 4  ;;  %s1568_s1 = int_to_ptr.vmem [resolvable:$false] %s1567_s1 }
  0x53   : > { %p1551_p5 = pneg %p1917_p2  ;;  %s1569_s18 = scalar_lea.vmem %s1568_s1, 64 }
  0x54   : > { %p1570_p12 = scmp.lt.s32.totalorder %s228_s30, %s1568_s1  ;;  %p1571_p4 = scmp.lt.s32.totalorder %s1569_s18, %s1562_s0 }
  0x55   : > { %p1565_p7 = pnand %p1563_p6, %p1551_p5 }
  0x56   : > { %p1572_p3 = por %p1571_p4, %p1570_p12 }
  0x57   : > { %p1566_p13 = pneg %p1565_p7 }
  0x59   : > { %p1573_p0 = pnand %p1572_p3, %p1566_p13 }
  0x5b   : > { %1576 = shalt.err (!%p1573_p0)
}
  0x5c   : > { %1288 = dma.hbm_to_vmem [thread:$0]  (!%p1917_p2), %s225_s29, 32, %s228_s30, %s1843_s6  }
  0x5d   : > { %244 = sbr.rel (%p1865_p11) target bundleno = 506 (0x1fa), region = 36  ;;  %p2186_p10 = scmp.eq.s32.totalorder (!%p1865_p11), %s1851_s5, 0 }
  0x62   : > { %1648 = dma.done.wait (%p2186_p10), [#allocation3], 2048   ;;  %p2187_p8 = pmov %p2186_p10 }
  0x63   : > { %s250_s0 = sand.u32 1, %s1851_s5   ;;  %s252_s1 = sand.u32 1, %s1681_s19  }
  0x64   : > { %1650 = vsyncadd (%p2187_p8), [#allocation3], 4294965248  ;;  %s1180_s3 = sshll.u32 %s252_s1, 9  ;;  %s251_s11 = scalar_lea.sflag [#allocation6], %s250_s0 }
  0x65   : > { %s1934_s12 = scalar_lea.vmem [#allocation5], %s1180_s3 }
  0x66   : > { %1652 = dma.done.wait (%p1860_p9), %s251_s11, 8192  }
  0x67   : > { %1654 = vsyncadd (%p1860_p9), %s251_s11, 4294959104  ;;  %s1941_s6 = sand.u32 1, %s1669_s16  }
  0x68   : > { %s1181_s10 = sshll.u32 %s1941_s6, 1 }
  0x69   : > { %s1944_s13 = scalar_lea.vmem [#allocation7], %s1181_s10 }
  0x6a   : > { %1656 = dma.done.wait (%p1900_p1), %s251_s11, 32  }
  0x6b   : > { %1658 = vsyncadd (%p1900_p1), %s251_s11, 4294967264  ;;  %s1182_s5 = sshll.u32 %s1941_s6, 6  ;;  %s1183_s29 = sshll.u32 %s1693_s22, 1 }
  0x6c   : > { %p301_p4 = scmp.lt.s32.totalorder %s1183_s29, 3  ;;  %s2188_s30 = sld [smem:[#allocation18_spill]] }
  0x6d   : > { %s1958_s27 = scalar_lea.vmem [#allocation8], %s1182_s5  ;;  %s2189_s18 = sld [smem:[#allocation13_spill]] }
  0x6e   : > { %s2214_s29 = smov (!%p301_p4, %s1183_s29), 3 }
  0x72   : > { %s303_s26 = scalar_lea.vmem %s2188_s30, %s2214_s29 }
  0x73   : > { %p1184_p9 = scmp.ne.s32.totalorder %s2189_s18, 0 }
  0x75   : > { %309 = sbr.rel (%p1184_p9) target bundleno = 127 (0x7f), region = 52 }
  0x7a   : > { %v1715_v0 = vmov 0.0  }
  0x7b   : > { %310 = vst [vmem:[%s1958_s27] sm:$0xff] %v1715_v0  ;;  %311 = vst [vmem:[%s1958_s27 + $0x8] sm:$0xff] %v1715_v0 }
  0x7c   : > { %312 = vst [vmem:[%s1958_s27 + $0x10] sm:$0xff] %v1715_v0  ;;  %313 = vst [vmem:[%s1958_s27 + $0x18] sm:$0xff] %v1715_v0 }
  0x7d   : > { %314 = vst [vmem:[%s1958_s27 + $0x20] sm:$0xff] %v1715_v0  ;;  %315 = vst [vmem:[%s1958_s27 + $0x28] sm:$0xff] %v1715_v0 }
  0x7e   : > { %316 = vst [vmem:[%s1958_s27 + $0x30] sm:$0xff] %v1715_v0  ;;  %317 = vst [vmem:[%s1958_s27 + $0x38] sm:$0xff] %v1715_v0 }
  0x7f PF: > { %v1395_v1 = vld [vmem:[%s1934_s12 + $0x74] ss:$8 sps:$4 sm:$0xff]   ;;  %v1399_v3 = vld [vmem:[%s1934_s12 + $0x70] ss:$8 sps:$4 sm:$0xff]   ;;  %v1401_v5 = vld [vmem:[%s1934_s12 + $0x64] ss:$8 sps:$4 sm:$0xff]  }
  0x80   : > { %v1397_v2 = vld [vmem:[%s1934_s12 + $0x174] ss:$8 sps:$4 sm:$0xff]   ;;  %763 = vmatprep.subr.bf16.mxu0 %v1395_v1  ;;  %v1400_v4 = vld [vmem:[%s1934_s12 + $0x170] ss:$8 sps:$4 sm:$0xff]   ;;  %v1403_v6 = vld [vmem:[%s1934_s12 + $0x164] ss:$8 sps:$4 sm:$0xff]  }
  0x81   : > { %816 = vmatprep.subr.bf16.mxu1 %v1397_v2  ;;  %764 = vmatpush1.bf16.msra.mxu0 %v1399_v3  ;;  %v1405_v7 = vld [vmem:[%s1934_s12 + $0x60] ss:$8 sps:$4 sm:$0xff]   ;;  %v1407_v9 = vld [vmem:[%s1934_s12 + $0x54] ss:$8 sps:$4 sm:$0xff]   ;;  %v1411_v11 = vld [vmem:[%s1934_s12 + $0x50] ss:$8 sps:$4 sm:$0xff]  }
  0x82   : > { %817 = vmatpush1.bf16.msra.mxu1 %v1400_v4  ;;  %765 = vmatprep.subr.bf16.mxu0 %v1401_v5  ;;  %v1406_v8 = vld [vmem:[%s1934_s12 + $0x160] ss:$8 sps:$4 sm:$0xff]   ;;  %v1409_v10 = vld [vmem:[%s1934_s12 + $0x154] ss:$8 sps:$4 sm:$0xff]   ;;  %v1412_v12 = vld [vmem:[%s1934_s12 + $0x150] ss:$8 sps:$4 sm:$0xff]  }
  0x83   : > { %818 = vmatprep.subr.bf16.mxu1 %v1403_v6  ;;  %v1413_v13 = vld [vmem:[%s1934_s12 + $0x44] ss:$8 sps:$4 sm:$0xff]   ;;  %v1417_v15 = vld [vmem:[%s1934_s12 + $0x40] ss:$8 sps:$4 sm:$0xff]   ;;  %v1419_v17 = vld [vmem:[%s1934_s12 + $0x34] ss:$8 sps:$4 sm:$0xff]  }
  0x84   : > { %v1415_v14 = vld [vmem:[%s1934_s12 + $0x144] ss:$8 sps:$4 sm:$0xff]   ;;  %v1418_v16 = vld [vmem:[%s1934_s12 + $0x140] ss:$8 sps:$4 sm:$0xff]   ;;  %v1421_v18 = vld [vmem:[%s1934_s12 + $0x134] ss:$8 sps:$4 sm:$0xff]  }
  0x85   : > { %766 = vmatpush1.bf16.msra.mxu0 %v1405_v7  ;;  %v1423_v19 = vld [vmem:[%s1934_s12 + $0x30] ss:$8 sps:$4 sm:$0xff]   ;;  %v1425_v21 = vld [vmem:[%s1934_s12 + $0x24] ss:$8 sps:$4 sm:$0xff]   ;;  %v1429_v23 = vld [vmem:[%s1934_s12 + $0x20] ss:$8 sps:$4 sm:$0xff]  }
  0x86   : > { %819 = vmatpush1.bf16.msra.mxu1 %v1406_v8  ;;  %767 = vmatprep.subr.bf16.mxu0 %v1407_v9  ;;  %v1424_v20 = vld [vmem:[%s1934_s12 + $0x130] ss:$8 sps:$4 sm:$0xff]   ;;  %v1427_v22 = vld [vmem:[%s1934_s12 + $0x124] ss:$8 sps:$4 sm:$0xff]   ;;  %v1430_v24 = vld [vmem:[%s1934_s12 + $0x120] ss:$8 sps:$4 sm:$0xff]  }
  0x87   : > { %820 = vmatprep.subr.bf16.mxu1 %v1409_v10  ;;  %v1431_v25 = vld [vmem:[%s1934_s12 + $0x14] ss:$8 sps:$4 sm:$0xff]   ;;  %v1435_v27 = vld [vmem:[%s1934_s12 + $0x10] ss:$8 sps:$4 sm:$0xff]   ;;  %s2190_s7 = sld [smem:[#allocation13_spill]] }
  0x88   : > { %v1433_v26 = vld [vmem:[%s1934_s12 + $0x114] ss:$8 sps:$4 sm:$0xff]   ;;  %v1436_v28 = vld [vmem:[%s1934_s12 + $0x110] ss:$8 sps:$4 sm:$0xff]   ;;  %v1437_v29 = vld [vmem:[%s1934_s12 + $0x4] ss:$8 sps:$4 sm:$0xff]  }
  0x89   : > { %768 = vmatpush1.bf16.msra.mxu0 %v1411_v11  ;;  %v1439_v30 = vld [vmem:[%s1934_s12 + $0x104] ss:$8 sps:$4 sm:$0xff]   ;;  %v1441_v31 = vld [vmem:[%s1934_s12] ss:$8 sps:$4 sm:$0xff]   ;;  %v1443_v33 = vld [vmem:[%s1934_s12 + $0xf4] ss:$8 sps:$4 sm:$0xff]  }
  0x8a   : > { %821 = vmatpush1.bf16.msra.mxu1 %v1412_v12  ;;  %769 = vmatprep.subr.bf16.mxu0 %v1413_v13  ;;  %v1442_v32 = vld [vmem:[%s1934_s12 + $0x100] ss:$8 sps:$4 sm:$0xff]   ;;  %v1445_v34 = vld [vmem:[%s1934_s12 + $0x1f4] ss:$8 sps:$4 sm:$0xff]   ;;  %v1447_v35 = vld [vmem:[%s1934_s12 + $0xf0] ss:$8 sps:$4 sm:$0xff]  }
  0x8b   : > { %822 = vmatprep.subr.bf16.mxu1 %v1415_v14  ;;  %v1448_v36 = vld [vmem:[%s1934_s12 + $0x1f0] ss:$8 sps:$4 sm:$0xff]   ;;  %v1449_v37 = vld [vmem:[%s1934_s12 + $0xe4] ss:$8 sps:$4 sm:$0xff]   ;;  %v1453_v39 = vld [vmem:[%s1934_s12 + $0xe0] ss:$8 sps:$4 sm:$0xff]  }
  0x8c   : > { %v1451_v38 = vld [vmem:[%s1934_s12 + $0x1e4] ss:$8 sps:$4 sm:$0xff]   ;;  %v1454_v40 = vld [vmem:[%s1934_s12 + $0x1e0] ss:$8 sps:$4 sm:$0xff]   ;;  %v1455_v41 = vld [vmem:[%s1934_s12 + $0xd4] ss:$8 sps:$4 sm:$0xff]  }
  0x8d   : > { %770 = vmatpush1.bf16.msra.mxu0 %v1417_v15  ;;  %s1185_s0 = sshll.u32 %s2190_s7, 9  ;;  %v1457_v42 = vld [vmem:[%s1934_s12 + $0x1d4] ss:$8 sps:$4 sm:$0xff]   ;;  %v1459_v43 = vld [vmem:[%s1934_s12 + $0xd0] ss:$8 sps:$4 sm:$0xff]   ;;  %p1259_p11 = scmp.ne.s32.totalorder %s2190_s7, 1 }
  0x8e   : > { %823 = vmatpush1.bf16.msra.mxu1 %v1418_v16  ;;  %771 = vmatprep.subr.bf16.mxu0 %v1419_v17  ;;  %s319_s1 = sshra.s32 %s1185_s0, 7  ;;  %v1460_v44 = vld [vmem:[%s1934_s12 + $0x1d0] ss:$8 sps:$4 sm:$0xff]   ;;  %v1461_v45 = vld [vmem:[%s1934_s12 + $0xc4] ss:$8 sps:$4 sm:$0xff]  }
  0x8f   : > { %824 = vmatprep.subr.bf16.mxu1 %v1421_v18  ;;  %s1186_s3 = sshll.u32 %s319_s1, 2  ;;  %v1463_v46 = vld [vmem:[%s1934_s12 + $0x1c4] ss:$8 sps:$4 sm:$0xff]   ;;  %v1465_v51 = vld [vmem:[%s1934_s12 + $0xc0] ss:$8 sps:$4 sm:$0xff]  }
  0x90   : > { %s2016_s11 = scalar_lea.vmem [#allocation2], %s1186_s3  ;;  %v1466_v52 = vld [vmem:[%s1934_s12 + $0x1c0] ss:$8 sps:$4 sm:$0xff]   ;;  %v1467_v54 = vld [vmem:[%s1934_s12 + $0xb4] ss:$8 sps:$4 sm:$0xff]  }
  0x91   : > { %772 = vmatpush1.bf16.msra.mxu0 %v1423_v19  ;;  %v323_v47 = vld [vmem:[%s2016_s11] sm:$0xff]  ;;  %v324_v49 = vld [vmem:[%s2016_s11 + $0x8] sm:$0xff]  ;;  %v1469_v55 = vld [vmem:[%s1934_s12 + $0x1b4] ss:$8 sps:$4 sm:$0xff]  }
  0x92   : > { %825 = vmatpush1.bf16.msra.mxu1 %v1424_v20  ;;  %773 = vmatprep.subr.bf16.mxu0 %v1425_v21  ;;  %v325_v48 = vld [vmem:[%s2016_s11 + $0x20] sm:$0xff]  ;;  %v326_v50 = vld [vmem:[%s2016_s11 + $0x28] sm:$0xff]  ;;  %v1471_v57 = vld [vmem:[%s1934_s12 + $0xb0] ss:$8 sps:$4 sm:$0xff]  }
  0x93   : > { %826 = vmatprep.subr.bf16.mxu1 %v1427_v22  ;;  %v1188_v53 = vcombine.high %v323_v47, %v325_v48  ;;  %v1190_v56 = vcombine.high %v324_v49, %v326_v50  ;;  %v1472_v58 = vld [vmem:[%s1934_s12 + $0x1b0] ss:$8 sps:$4 sm:$0xff]   ;;  %v1473_v59 = vld [vmem:[%s1934_s12 + $0xa4] ss:$8 sps:$4 sm:$0xff]   ;;  %v1477_v61 = vld [vmem:[%s1934_s12 + $0xa0] ss:$8 sps:$4 sm:$0xff]   ;;  %v1187_v11 = vcombine.low %v323_v47, %v325_v48  ;;  %v1189_v12 = vcombine.low %v324_v49, %v326_v50 }
  0x94   : > { %v1475_v60 = vld [vmem:[%s1934_s12 + $0x1a4] ss:$8 sps:$4 sm:$0xff]   ;;  %v1478_v62 = vld [vmem:[%s1934_s12 + $0x1a0] ss:$8 sps:$4 sm:$0xff]   ;;  %v1479_v63 = vld [vmem:[%s1934_s12 + $0x94] ss:$8 sps:$4 sm:$0xff]  }
  0x95   : > { %774 = vmatpush1.bf16.msra.mxu0 %v1429_v23  ;;  %795 = vmatprep.mubr.bf16.mxu0 %v1188_v53  ;;  %v1481_v0 = vld [vmem:[%s1934_s12 + $0x194] ss:$8 sps:$4 sm:$0xff]   ;;  %v1483_v1 = vld [vmem:[%s1934_s12 + $0x90] ss:$8 sps:$4 sm:$0xff]   ;;  %v1485_v3 = vld [vmem:[%s1934_s12 + $0x84] ss:$8 sps:$4 sm:$0xff]  }
  0x96   : > { %827 = vmatpush1.bf16.msra.mxu1 %v1430_v24  ;;  %775 = vmatprep.subr.bf16.mxu0 %v1431_v25  ;;  %v1484_v2 = vld [vmem:[%s1934_s12 + $0x190] ss:$8 sps:$4 sm:$0xff]   ;;  %v1487_v4 = vld [vmem:[%s1934_s12 + $0x184] ss:$8 sps:$4 sm:$0xff]   ;;  %v1489_v5 = vld [vmem:[%s1934_s12 + $0x80] ss:$8 sps:$4 sm:$0xff]  }
  0x97   : > { %828 = vmatprep.subr.bf16.mxu1 %v1433_v26  ;;  %848 = vmatprep.mubr.bf16.mxu1 %v1190_v56  ;;  %v1490_v6 = vld [vmem:[%s1934_s12 + $0x180] ss:$8 sps:$4 sm:$0xff]   ;;  %v332_v22 = vld [vmem:[%s1958_s27 + $0x8] sm:$0xff]  ;;  %v337_v47 = vld [vmem:[%s1958_s27 + $0x30] sm:$0xff] }
  0x98   : > { %v327_v7 = vld [vmem:[%s2016_s11 + $0x40] sm:$0xff]  ;;  %v328_v9 = vld [vmem:[%s2016_s11 + $0x48] sm:$0xff] }
  0x99   : > { %776 = vmatpush1.bf16.msra.mxu0 %v1435_v27  ;;  %v329_v8 = vld [vmem:[%s2016_s11 + $0x60] sm:$0xff]  ;;  %v330_v10 = vld [vmem:[%s2016_s11 + $0x68] sm:$0xff]  ;;  %v333_v27 = vld [vmem:[%s1958_s27 + $0x10] sm:$0xff] }
  0x9a   : > { %829 = vmatpush1.bf16.msra.mxu1 %v1436_v28  ;;  %777 = vmatprep.subr.bf16.mxu0 %v1437_v29  ;;  %v1192_v13 = vcombine.high %v327_v7, %v329_v8  ;;  %v1194_v14 = vcombine.high %v328_v9, %v330_v10  ;;  %v1191_v15 = vcombine.low %v327_v7, %v329_v8  ;;  %v331_v18 = vld [vmem:[%s1958_s27] sm:$0xff] }
  0x9b   : > { %830 = vmatprep.subr.bf16.mxu1 %v1439_v30  ;;  %v1193_v16 = vcombine.low %v328_v9, %v330_v10 }
  0x9d   : > { %778 = vmatpush1.bf16.msra.mxu0 %v1441_v31 }
  0x9e   : > { %831 = vmatpush1.bf16.msra.mxu1 %v1442_v32  ;;  %779 = vmatprep.subr.bf16.mxu0 %v1443_v33  ;;  %v334_v32 = vld [vmem:[%s1958_s27 + $0x18] sm:$0xff] }
  0x9f   : > { %832 = vmatprep.subr.bf16.mxu1 %v1445_v34 }
  0xa1   : > { %780 = vmatpush2.bf16.msra.mxu0 %v1447_v35 }
  0xa2   : > { %833 = vmatpush2.bf16.msra.mxu1 %v1448_v36  ;;  %781 = vmatprep.subr.bf16.mxu0 %v1449_v37  ;;  %v335_v37 = vld [vmem:[%s1958_s27 + $0x20] sm:$0xff] }
  0xa3   : > { %834 = vmatprep.subr.bf16.mxu1 %v1451_v38 }
  0xa5   : > { %782 = vmatpush2.bf16.msra.mxu0 %v1453_v39 }
  0xa6   : > { %835 = vmatpush2.bf16.msra.mxu1 %v1454_v40  ;;  %783 = vmatprep.subr.bf16.mxu0 %v1455_v41 }
  0xa7   : > { %836 = vmatprep.subr.bf16.mxu1 %v1457_v42  ;;  %v336_v42 = vld [vmem:[%s1958_s27 + $0x28] sm:$0xff] }
  0xa9   : > { %784 = vmatpush2.bf16.msra.mxu0 %v1459_v43 }
  0xaa   : > { %837 = vmatpush2.bf16.msra.mxu1 %v1460_v44  ;;  %785 = vmatprep.subr.bf16.mxu0 %v1461_v45 }
  0xab   : > { %838 = vmatprep.subr.bf16.mxu1 %v1463_v46 }
  0xad   : > { %786 = vmatpush2.bf16.msra.mxu0 %v1465_v51 }
  0xae   : > { %839 = vmatpush2.bf16.msra.mxu1 %v1466_v52  ;;  %787 = vmatprep.subr.bf16.mxu0 %v1467_v54  ;;  %v338_v52 = vld [vmem:[%s1958_s27 + $0x38] sm:$0xff] }
  0xaf   : > { %840 = vmatprep.subr.bf16.mxu1 %v1469_v55 }
  0xb1   : > { %788 = vmatpush2.bf16.msra.mxu0 %v1471_v57 }
  0xb2   : > { %841 = vmatpush2.bf16.msra.mxu1 %v1472_v58  ;;  %789 = vmatprep.subr.bf16.mxu0 %v1473_v59 }
  0xb3   : > { %842 = vmatprep.subr.bf16.mxu1 %v1475_v60 }
  0xb5   : > { %790 = vmatpush2.bf16.msra.mxu0 %v1477_v61 }
  0xb6   : > { %843 = vmatpush2.bf16.msra.mxu1 %v1478_v62  ;;  %791 = vmatprep.subr.bf16.mxu0 %v1479_v63 }
  0xb7   : > { %844 = vmatprep.subr.bf16.mxu1 %v1481_v0 }
  0xb9   : > { %792 = vmatpush2.bf16.msra.mxu0 %v1483_v1 }
  0xba   : > { %845 = vmatpush2.bf16.msra.mxu1 %v1484_v2  ;;  %793 = vmatprep.subr.bf16.mxu0 %v1485_v3 }
  0xbb   : > { %846 = vmatprep.subr.bf16.mxu1 %v1487_v4 }
  0xbd   : > { %794 = vmatpush2.bf16.msra.mxu0 %v1489_v5 }
  0xbe   : > { %847 = vmatpush2.bf16.msra.mxu1 %v1490_v6 }
  0xc0   : > { %796 = vmatmul.mubr.bf16.vlgmr.msra.gmra.mxu0 %v1187_v11 }
  0xc1   : > { %849 = vmatmul.mubr.bf16.vlgmr.msra.gmra.mxu1 %v1189_v12  ;;  %805 = vmatprep.mubr.bf16.mxu0 %v1192_v13 }
  0xc2   : > { %858 = vmatprep.mubr.bf16.mxu1 %v1194_v14 }
  0xc8   : > { %806 = vmatmul.mubr.bf16.gmra.mxu0 %v1191_v15 }
  0xc9   : > { %859 = vmatmul.mubr.bf16.gmra.mxu1 %v1193_v16 }
 0x180   : > { %v797_v17 = vpop.f32.mrf.mxu0 }
 0x181   : > { %v850_v19 = vpop.f32.mrf.mxu1 }
 0x182   : > { %v851_v20 = vadd.f32 %v850_v19, %v797_v17  ;;  %v799_v21 = vpop.f32.mrf.mxu0 }
 0x183   : > { %v852_v23 = vpop.f32.mrf.mxu1 }
 0x184   : > { %v869_v24 = vadd.f32 %v851_v20, %v331_v18  ;;  %v853_v25 = vadd.f32 %v852_v23, %v799_v21  ;;  %v801_v26 = vpop.f32.mrf.mxu0 }
 0x185   : > { %v854_v28 = vpop.f32.mrf.mxu1 }
 0x186   : > { %877 = vst [vmem:[%s1958_s27] sm:$0xff] %v869_v24  ;;  %v870_v29 = vadd.f32 %v853_v25, %v332_v22  ;;  %v855_v30 = vadd.f32 %v854_v28, %v801_v26  ;;  %v803_v31 = vpop.f32.mrf.mxu0 }
 0x187   : > { %v856_v33 = vpop.f32.mrf.mxu1 }
 0x188   : > { %878 = vst [vmem:[%s1958_s27 + $0x8] sm:$0xff] %v870_v29  ;;  %v871_v34 = vadd.f32 %v855_v30, %v333_v27  ;;  %v857_v35 = vadd.f32 %v856_v33, %v803_v31  ;;  %v807_v36 = vpop.f32.mrf.mxu0 }
 0x189   : > { %v860_v38 = vpop.f32.mrf.mxu1 }
 0x18a   : > { %879 = vst [vmem:[%s1958_s27 + $0x10] sm:$0xff] %v871_v34  ;;  %v872_v39 = vadd.f32 %v857_v35, %v334_v32  ;;  %v861_v40 = vadd.f32 %v860_v38, %v807_v36  ;;  %v809_v41 = vpop.f32.mrf.mxu0 }
 0x18b   : > { %v862_v43 = vpop.f32.mrf.mxu1 }
 0x18c   : > { %880 = vst [vmem:[%s1958_s27 + $0x18] sm:$0xff] %v872_v39  ;;  %v873_v44 = vadd.f32 %v861_v40, %v335_v37  ;;  %v863_v45 = vadd.f32 %v862_v43, %v809_v41  ;;  %v811_v46 = vpop.f32.mrf.mxu0 }
 0x18d   : > { %v864_v48 = vpop.f32.mrf.mxu1 }
 0x18e   : > { %881 = vst [vmem:[%s1958_s27 + $0x20] sm:$0xff] %v873_v44  ;;  %v874_v49 = vadd.f32 %v863_v45, %v336_v42  ;;  %v865_v50 = vadd.f32 %v864_v48, %v811_v46  ;;  %v813_v51 = vpop.f32.mrf.mxu0 }
 0x18f   : > { %v866_v53 = vpop.f32.mrf.mxu1 }
 0x190   : > { %882 = vst [vmem:[%s1958_s27 + $0x28] sm:$0xff] %v874_v49  ;;  %v875_v54 = vadd.f32 %v865_v50, %v337_v47  ;;  %v867_v55 = vadd.f32 %v866_v53, %v813_v51  ;;  %888 = sbr.rel (%p1259_p11) target bundleno = 479 (0x1df), region = 56 }
 0x192   : > { %883 = vst [vmem:[%s1958_s27 + $0x30] sm:$0xff] %v875_v54  ;;  %v876_v56 = vadd.f32 %v867_v55, %v338_v52 }
 0x194   : > { %884 = vst [vmem:[%s1958_s27 + $0x38] sm:$0xff] %v876_v56 }
 0x195   : > { %v889_v57 = vld [vmem:[%s1958_s27] sm:$0xff]  ;;  %v891_v58 = vld [vmem:[%s1958_s27 + $0x10] sm:$0xff]  ;;  %v890_v62 = vld [vmem:[%s1958_s27 + $0x8] sm:$0xff] }
 0x196   : > { %v893_v59 = vld [vmem:[%s1958_s27 + $0x20] sm:$0xff]  ;;  %v897_v61 = vadd.f32 %v891_v58, %v889_v57  ;;  %v892_v63 = vld [vmem:[%s1958_s27 + $0x18] sm:$0xff] }
 0x197   : > { %v894_v0 = vld [vmem:[%s1958_s27 + $0x28] sm:$0xff]  ;;  %v906_v2 = vadd.f32 %v892_v63, %v890_v62 }
 0x198   : > { %v898_v1 = vadd.f32 %v897_v61, %v893_v59 }
 0x199   : > { %v895_v60 = vld [vmem:[%s1958_s27 + $0x30] sm:$0xff]  ;;  %v907_v5 = vadd.f32 %v906_v2, %v894_v0 }
 0x19a   : > { %v899_v4 = vadd.f32 %v898_v1, %v895_v60 }
 0x19b   : > { %v896_v3 = vld [vmem:[%s1958_s27 + $0x38] sm:$0xff] }
 0x19c   : > { %v900_v6 = vrot.slane %v899_v4, 4  ;;  %v908_v7 = vadd.f32 %v907_v5, %v896_v3 }
 0x19e   : > { %v901_v8 = vadd.f32 %v900_v6, %v899_v4  ;;  %v909_v9 = vrot.slane %v908_v7, 4 }
 0x1a0   : > { %v902_v10 = vrot.slane %v901_v8, 2  ;;  %v910_v11 = vadd.f32 %v909_v9, %v908_v7 }
 0x1a2   : > { %v903_v12 = vadd.f32 %v902_v10, %v901_v8  ;;  %v911_v13 = vrot.slane %v910_v11, 2 }
 0x1a4   : > { %v904_v14 = vrot.slane %v903_v12, 1  ;;  %v912_v15 = vadd.f32 %v911_v13, %v910_v11 }
 0x1a6   : > { %v905_v16 = vadd.f32 %v904_v14, %v903_v12  ;;  %v913_v17 = vrot.slane %v912_v15, 1 }
 0x1a8   : > { %v915_v18 = vmul.f32 0.03125, %v905_v16  ;;  %v914_v19 = vadd.f32 %v913_v17, %v912_v15 }
 0x1aa   : > { %v917_v20 = vsub.f32 %v889_v57, %v915_v18  ;;  %v919_v21 = vsub.f32 %v891_v58, %v915_v18  ;;  %v921_v22 = vsub.f32 %v893_v59, %v915_v18  ;;  %v923_v23 = vsub.f32 %v895_v60, %v915_v18 }
 0x1ab   : > { %v916_v24 = vmul.f32 0.03125, %v914_v19  ;;  %v967_v58 = vlaneseq }
 0x1ac   : > { %v925_v25 = vmul.f32 %v917_v20, %v917_v20  ;;  %v927_v26 = vmul.f32 %v919_v21, %v919_v21  ;;  %v929_v27 = vmul.f32 %v921_v22, %v921_v22  ;;  %v931_v32 = vmul.f32 %v923_v23, %v923_v23 }
 0x1ad   : > { %v918_v28 = vsub.f32 %v890_v62, %v916_v24  ;;  %v920_v29 = vsub.f32 %v892_v63, %v916_v24  ;;  %v922_v30 = vsub.f32 %v894_v0, %v916_v24  ;;  %v924_v31 = vsub.f32 %v896_v3, %v916_v24  ;;  %v965_v62 = vld [vmem:[%s1944_s13] sm:$0x3] }
 0x1ae   : > { %v933_v33 = vadd.f32 %v927_v26, %v925_v25  ;;  %v968_v60 = vshrl.u32 %v967_v58, 7  ;;  %v985_v63 = vld [vmem:[%s303_s26] sm:$0x3] }
 0x1af   : > { %v926_v34 = vmul.f32 %v918_v28, %v918_v28  ;;  %v928_v35 = vmul.f32 %v920_v29, %v920_v29  ;;  %v930_v36 = vmul.f32 %v922_v30, %v922_v30  ;;  %v932_v38 = vmul.f32 %v924_v31, %v924_v31 }
 0x1b0   : > { %v934_v37 = vadd.f32 %v933_v33, %v929_v27  ;;  %v969_v61 = vsub.s32 0, %v968_v60  ;;  %v973_v0 = vsub.s32 1, %v968_v60 }
 0x1b1   : > { %v942_v39 = vadd.f32 %v928_v35, %v926_v34 }
 0x1b2   : > { %v935_v40 = vadd.f32 %v934_v37, %v931_v32  ;;  %v970_v1 = vrot.slane %v965_v62, %v969_v61  ;;  %v990_v3 = vrot.slane %v985_v63, %v969_v61  ;;  %v974_v8 = vrot.slane %v965_v62, %v973_v0 }
 0x1b3   : > { %v943_v41 = vadd.f32 %v942_v39, %v930_v36  ;;  %v994_v9 = vrot.slane %v985_v63, %v973_v0 }
 0x1b4   : > { %v936_v42 = vrot.slane %v935_v40, 4 }
 0x1b5   : > { %v944_v43 = vadd.f32 %v943_v41, %v932_v38 }
 0x1b6   : > { %v937_v44 = vadd.f32 %v936_v42, %v935_v40 }
 0x1b7   : > { %v945_v45 = vrot.slane %v944_v43, 4 }
 0x1b8   : > { %v938_v46 = vrot.slane %v937_v44, 2 }
 0x1b9   : > { %v946_v47 = vadd.f32 %v945_v45, %v944_v43 }
 0x1ba   : > { %v939_v48 = vadd.f32 %v938_v46, %v937_v44 }
 0x1bb   : > { %v947_v49 = vrot.slane %v946_v47, 2 }
 0x1bc   : > { %v940_v50 = vrot.slane %v939_v48, 1 }
 0x1bd   : > { %v948_v51 = vadd.f32 %v947_v49, %v946_v47 }
 0x1be   : > { %v941_v52 = vadd.f32 %v940_v50, %v939_v48 }
 0x1bf   : > { %v949_v53 = vrot.slane %v948_v51, 1 }
 0x1c0   : > { %v951_v54 = vmul.f32 0.03125, %v941_v52 }
 0x1c1   : > { %v950_v55 = vadd.f32 %v949_v53, %v948_v51 }
 0x1c2   : > { %v953_v56 = vadd.f32 1e-05, %v951_v54 }
 0x1c3   : > { %v952_v57 = vmul.f32 0.03125, %v950_v55 }
 0x1c4   : > { %1491 = vrsqrt.f32 %v953_v56 }
 0x1c5   : > { %v954_v59 = vadd.f32 1e-05, %v952_v57 }
 0x1c7   : > { %1493 = vrsqrt.f32 %v954_v59 }
 0x1d1   : > { %v1492_v2 = vpop.eup %1491 }
 0x1d2   : > { %v957_v4 = vmul.f32 %v1492_v2, %v917_v20  ;;  %v959_v5 = vmul.f32 %v1492_v2, %v919_v21  ;;  %v961_v6 = vmul.f32 %v1492_v2, %v921_v22  ;;  %v963_v7 = vmul.f32 %v1492_v2, %v923_v23 }
 0x1d4   : > { %v1494_v10 = vpop.eup %1493  ;;  %v977_v11 = vmul.f32 %v970_v1, %v957_v4  ;;  %v979_v12 = vmul.f32 %v970_v1, %v959_v5  ;;  %v981_v13 = vmul.f32 %v970_v1, %v961_v6  ;;  %v983_v14 = vmul.f32 %v970_v1, %v963_v7 }
 0x1d5   : > { %v958_v15 = vmul.f32 %v1494_v10, %v918_v28  ;;  %v960_v16 = vmul.f32 %v1494_v10, %v920_v29  ;;  %v962_v17 = vmul.f32 %v1494_v10, %v922_v30  ;;  %v964_v18 = vmul.f32 %v1494_v10, %v924_v31 }
 0x1d6   : > { %v997_v19 = vadd.f32 %v990_v3, %v977_v11  ;;  %v999_v24 = vadd.f32 %v990_v3, %v979_v12  ;;  %v1001_v25 = vadd.f32 %v990_v3, %v981_v13  ;;  %v1003_v20 = vadd.f32 %v990_v3, %v983_v14 }
 0x1d7   : > { %v978_v21 = vmul.f32 %v974_v8, %v958_v15  ;;  %v980_v22 = vmul.f32 %v974_v8, %v960_v16  ;;  %v982_v23 = vmul.f32 %v974_v8, %v962_v17  ;;  %v984_v26 = vmul.f32 %v974_v8, %v964_v18 }
 0x1d8   : > { %v1005_v27 = vmax.f32 %v997_v19, 0.0  ;;  %v1007_v32 = vmax.f32 %v999_v24, 0.0  ;;  %v1009_v28 = vmax.f32 %v1001_v25, 0.0  ;;  %v1011_v29 = vmax.f32 %v1003_v20, 0.0 }
 0x1d9   : > { %v998_v30 = vadd.f32 %v994_v9, %v978_v21  ;;  %v1000_v31 = vadd.f32 %v994_v9, %v980_v22  ;;  %v1002_v33 = vadd.f32 %v994_v9, %v982_v23  ;;  %v1004_v34 = vadd.f32 %v994_v9, %v984_v26 }
 0x1da   : > { %1013 = vst [vmem:[%s1958_s27] sm:$0xff] %v1005_v27  ;;  %1015 = vst [vmem:[%s1958_s27 + $0x10] sm:$0xff] %v1007_v32 }
 0x1db   : > { %1017 = vst [vmem:[%s1958_s27 + $0x20] sm:$0xff] %v1009_v28  ;;  %1019 = vst [vmem:[%s1958_s27 + $0x30] sm:$0xff] %v1011_v29  ;;  %v1006_v35 = vmax.f32 %v998_v30, 0.0  ;;  %v1008_v36 = vmax.f32 %v1000_v31, 0.0  ;;  %v1010_v37 = vmax.f32 %v1002_v33, 0.0  ;;  %v1012_v38 = vmax.f32 %v1004_v34, 0.0 }
 0x1dd   : > { %1014 = vst [vmem:[%s1958_s27 + $0x8] sm:$0xff] %v1006_v35  ;;  %1016 = vst [vmem:[%s1958_s27 + $0x18] sm:$0xff] %v1008_v36 }
 0x1de   : > { %1018 = vst [vmem:[%s1958_s27 + $0x28] sm:$0xff] %v1010_v37  ;;  %1020 = vst [vmem:[%s1958_s27 + $0x38] sm:$0xff] %v1012_v38 }
 0x1df PF: > { %s1267_s13 = sshll.u32 %s1693_s22, 8  ;;  %s2192_s28 = sld [smem:[#allocation19_spill]] }
 0x1e0   : > { %s1035_s26 = sshll.u32 %s1958_s27, 4  ;;  %s1022_s18 = scalar_lea.sflag [#allocation4], %s1941_s6  ;;  %s2090_s26 = int_to_ptr.vmem [resolvable:$true] %s1035_s26 }
 0x1e1   : > { %s1577_s7 = scalar_lea.vmem %s2090_s26, 1024  ;;  %p2193_p1 = scmp.ne.s32.totalorder %s2181_s4, 0 }
 0x1e2   : > { %p1578_p0 = scmp.ne.s32.totalorder %s2090_s26, %s1577_s7  ;;  %s1716_s0 = smov [#allocation8]  }
 0x1e3   : > { %s1581_s1 = sshll.u32 %s1716_s0, 4  ;;  %s1582_s1 = int_to_ptr.vmem [resolvable:$false] %s1581_s1 }
 0x1e4   : > { %p1579_p3 = pnand %p1578_p0, %p2193_p1  ;;  %s1583_s22 = scalar_lea.vmem %s1582_s1, 2048 }
 0x1e5   : > { %s2087_s30 = scalar_lea.hbm %s2192_s28, %s1267_s13  ;;  %p1584_p5 = scmp.lt.s32.totalorder %s2090_s26, %s1582_s1 }
 0x1e6   : > { %p1580_p2 = pneg %p1579_p3  ;;  %p1585_p6 = scmp.lt.s32.totalorder %s1583_s22, %s1577_s7 }
 0x1e8   : > { %p1586_p7 = por %p1585_p6, %p1584_p5 }
 0x1ea   : > { %p1587_p13 = pnand %p1586_p7, %p1580_p2 }
 0x1ec   : > { %1590 = shalt.err (!%p1587_p13)
}
 0x1ed   : > { %s1591_s27 = scalar_lea.hbm %s2087_s30, 1024  ;;  %s1595_s12 = scalar_lea.hbm %s2192_s28, 2048 }
 0x1ee   : > { %p1592_p12 = scmp.ne.s32.totalorder %s2087_s30, %s1591_s27  ;;  %p1596_p4 = scmp.lt.s32.totalorder %s2087_s30, %s2192_s28 }
 0x1ef   : > { %p1597_p9 = scmp.lt.s32.totalorder %s1595_s12, %s1591_s27 }
 0x1f0   : > { %p1593_p10 = pnand %p1592_p12, %p2193_p1 }
 0x1f1   : > { %p1598_p11 = por %p1597_p9, %p1596_p4 }
 0x1f2   : > { %p1594_p8 = pneg %p1593_p10 }
 0x1f4   : > { %p1599_p0 = pnand %p1598_p11, %p1594_p8 }
 0x1f6   : > { %1602 = shalt.err (!%p1599_p0)
}
 0x1f7   : > { %s1717_s13 = smov 256   ;;  %s1718_s29 = smov 512  }
 0x1f8   : > { %s1719_s9 = smov 16  }
 0x1f9   : > { %1276 = dma.vmem_to_hbm [thread:$0]  (%p2193_p1), %s2090_s26, 1024, %s2087_s30, %s1022_s18, %s1717_s13, %s1718_s29, %s1719_s9  }
 0x1fa PF: > { %p1296_p3 = scmp.ge.s32.totalorder %s1705_s25, 2  ;;  %s1050_s7 = sand.u32 1, %s1665_s15  }
 0x1fb   : > { %p2194_p2 = scmp.ne.s32.totalorder %s2183_s21, 0  ;;  %s1051_s0 = scalar_lea.sflag [#allocation4], %s1050_s7 }
 0x1fd   : > { %p1290_p5 = pnand %p1296_p3, %p2194_p2 }
 0x1ff   : > { %p1291_p6 = pneg %p1290_p5 }
 0x201   : > { %1660 = dma.done.wait (%p1291_p6), %s1051_s0, 1024  }
 0x202   : > { %1662 = vsyncadd (%p1291_p6), %s1051_s0, 4294966272  ;;  %s21_s25 = sadd.s32 1, %s1705_s25   ;;  %s2195_s4 = sld [smem:[#allocation14_spill]] }
 0x203   : > { %p18_p7 = scmp.ge.s32.totalorder %s21_s25, 6   ;;  %s2196_s6 = sld [smem:[#allocation15_spill]] }
 0x204   : > { %s2197_s15 = smov %s1669_s16  ;;  %s2198_s16 = smov %s1673_s17 }
 0x205   : > { %s2199_s17 = smov %s1882_s8  ;;  %s2200_s18 = smov %s1681_s19 }
 0x206   : > { %s2201_s19 = smov %s1685_s20  ;;  %s2202_s20 = smov %s1830_s14 }
 0x207   : > { %s2203_s21 = smov %s1697_s23  ;;  %s2204_s22 = smov %s1701_s24 }
 0x208   : > { %s2205_s23 = smov %s2195_s4  ;;  %20 = sbr.rel (!%p18_p7) target bundleno = 15 (0xf), region = 109 }
 0x209   : > { %s2206_s24 = smov %s2196_s6 }
 0x20d   :  { %1056 = vsyncpa [#allocation3], 1 }
 0x20e   :  { %1058 = vsyncpa [#allocation3 + $0x1], 1 }
 0x20f   :  { %1059 = vsyncpa [#allocation6], 1 }
 0x210   :  { %1061 = vsyncpa [#allocation6 + $0x1], 1 }
 0x211   :  { %1062 = vsyncpa [#allocation4], 1 }
 0x212   :  { %1064 = vsyncpa [#allocation4 + $0x1], 1 }

</bundles_post_ra>
